<compile_context>
chip_gen: v5e
topology: v5e:2x2
jax: 0.10.0
libtpu: 0.0.40
codegen_flags: <defaults>
</compile_context>

<pallas_src>
import jax
import jax.numpy as jnp
from jax.experimental import pallas as pl
from jax.experimental.pallas import tpu as pltpu

N_INPUT = 2        # MountainCarContinuous observation dim
N_OUTPUT = 1       # action dim
N_HIDDEN = 128
HEAD_ROWS = 8      # sublane-aligned packed head rows (0=mu, 1=sigma, 2=value, rest zero)
TB_MAX = 1024      # max batch tile (lanes) per grid step


def _softplus(x):
    # numerically stable softplus: max(x,0) + log1p(exp(-|x|))
    return jnp.maximum(x, 0.0) + jnp.log1p(jnp.exp(-jnp.abs(x)))


def actor_critic_kernel(xT_ref, wfcT_ref, bfc_ref, wheadT_ref, bhead_ref, out_ref):
    xT = xT_ref[...]                      # (N_INPUT, TB)   batch on lanes
    wfcT = wfcT_ref[...]                  # (N_HIDDEN, N_INPUT)

    # --- trunk on the VPU: h^T = relu(Wfc^T @ x^T + bfc), K=2 unrolled ---
    h = (bfc_ref[...]                                    # (N_HIDDEN, 1)
         + wfcT[:, 0:1] * xT[0:1, :]
         + wfcT[:, 1:2] * xT[1:2, :])
    h = jnp.maximum(h, 0.0)                              # (N_HIDDEN, TB)

    # --- fused heads: one MXU matmul, result already in (head, batch) layout ---
    z = jnp.dot(wheadT_ref[...], h,
                preferred_element_type=jnp.float32) + bhead_ref[...]   # (8, TB)

    # row-wise activation on the small (8, TB) slab:
    #   row 0 -> 2*tanh, row 1 -> softplus + 1e-5, row 2 -> identity (value)
    row = jax.lax.broadcasted_iota(jnp.int32, z.shape, 0)
    out_ref[...] = jnp.where(row == 0, 2.0 * jnp.tanh(z),
                             jnp.where(row == 1, _softplus(z) + 1e-5, z))


def pack_params(params):
    """One-time packing of PyTorch-style params into kernel layout."""
    wfc, bfc, wmu, bmu, wsg, bsg, wv, bv = params
    wfcT = wfc.T.astype(jnp.float32)                       # (N_HIDDEN, N_INPUT)
    bfcT = bfc.reshape(N_HIDDEN, 1).astype(jnp.float32)    # (N_HIDDEN, 1)
    wheadT = jnp.concatenate(
        [wmu.T, wsg.T, wv.T,
         jnp.zeros((HEAD_ROWS - 2 * N_OUTPUT - 1, N_HIDDEN), jnp.float32)],
        axis=0)                                            # (8, N_HIDDEN)
    bheadT = jnp.concatenate(
        [bmu.T, bsg.T, bv.T,
         jnp.zeros((HEAD_ROWS - 2 * N_OUTPUT - 1, 1), jnp.float32)],
        axis=0)                                            # (8, 1)
    return wfcT, bfcT, wheadT, bheadT


@jax.jit
def actor_critic_forward(x, packed_params):
    """x: (B, N_INPUT) f32.  packed_params: output of pack_params.
    Returns (mu, sigma, value), each (B, 1)."""
    wfcT, bfcT, wheadT, bheadT = packed_params
    B = x.shape[0]

    # Choose the batch tile: single grid step up to TB_MAX, multi-step beyond
    # (multi-step grid lets the "parallel" axis shard across v7x's 2 TCs).
    Bp = pl.cdiv(B, 128) * 128
    if Bp <= TB_MAX:
        TB = Bp
    else:
        TB = TB_MAX
        Bp = pl.cdiv(B, TB) * TB

    xT = x.T                                               # (N_INPUT, B), batch on lanes
    if Bp != B:
        xT = jnp.pad(xT, ((0, 0), (0, Bp - B)))

    cost = pl.CostEstimate(
        flops=2 * Bp * (N_INPUT * N_HIDDEN + N_HIDDEN * HEAD_ROWS),
        transcendentals=3 * HEAD_ROWS * Bp,
        bytes_accessed=4 * (N_INPUT * Bp + HEAD_ROWS * Bp
                            + N_HIDDEN * (N_INPUT + HEAD_ROWS + 1) + HEAD_ROWS),
    )

    packed = pl.pallas_call(
        actor_critic_kernel,
        out_shape=jax.ShapeDtypeStruct((HEAD_ROWS, Bp), jnp.float32),
        grid=(Bp // TB,),
        in_specs=[
            pl.BlockSpec((N_INPUT, TB), lambda i: (0, i)),        # x^T: streamed, lane-dense
            pl.BlockSpec((N_HIDDEN, N_INPUT), lambda i: (0, 0)),  # Wfc^T: resident
            pl.BlockSpec((N_HIDDEN, 1), lambda i: (0, 0)),        # bfc: resident
            pl.BlockSpec((HEAD_ROWS, N_HIDDEN), lambda i: (0, 0)),# fused head W^T: resident
            pl.BlockSpec((HEAD_ROWS, 1), lambda i: (0, 0)),       # fused head b: resident
        ],
        out_specs=pl.BlockSpec((HEAD_ROWS, TB), lambda i: (0, i)),
        compiler_params=pltpu.CompilerParams(
            dimension_semantics=("parallel",)),
        cost_estimate=cost,
    )(xT, wfcT, bfcT, wheadT, bheadT)

    out = packed[:3, :B].T                                 # (B, 3)
    mu = out[:, 0:N_OUTPUT]
    sigma = out[:, N_OUTPUT:2 * N_OUTPUT]
    value = out[:, 2 * N_OUTPUT:2 * N_OUTPUT + 1]
    # TODO(synk): torch.distributions.Normal has no Pallas equivalent; the
    # distribution parameters (mu, sigma) are returned instead.
    return mu, sigma, value


def init_linear(key, fan_in, fan_out):
    """PyTorch nn.Linear default init: U(-1/sqrt(fan_in), 1/sqrt(fan_in)).
    Weight returned already transposed to (fan_in, fan_out)."""
    kw, kb = jax.random.split(key)
    bound = 1.0 / jnp.sqrt(jnp.float32(fan_in))
    w = jax.random.uniform(kw, (fan_in, fan_out), jnp.float32, -bound, bound)
    b = jax.random.uniform(kb, (1, fan_out), jnp.float32, -bound, bound)
    return w, b


def reference_forward(x, params):
    wfc, bfc, wmu, bmu, wsg, bsg, wv, bv = params
    h = jnp.maximum(x @ wfc + bfc, 0.0)
    mu = 2.0 * jnp.tanh(h @ wmu + bmu)
    sigma = jax.nn.softplus(h @ wsg + bsg) + 1e-5
    value = h @ wv + bv
    return mu, sigma, value


if __name__ == "__main__":
    key = jax.random.PRNGKey(0)
    k_x, k_fc, k_mu, k_sg, k_v = jax.random.split(key, 5)

    # small batched rollout of states (not a multiple of 128 to exercise padding)
    B = 200
    x = jax.random.normal(k_x, (B, N_INPUT), dtype=jnp.float32)

    wfc, bfc = init_linear(k_fc, N_INPUT, N_HIDDEN)
    wmu, bmu = init_linear(k_mu, N_HIDDEN, N_OUTPUT)
    wsg, bsg = init_linear(k_sg, N_HIDDEN, N_OUTPUT)
    wv, bv = init_linear(k_v, N_HIDDEN, 1)
    params = (wfc, bfc, wmu, bmu, wsg, bsg, wv, bv)

    packed_params = jax.block_until_ready(pack_params(params))  # one-time packing

    mu, sigma, value = actor_critic_forward(x, packed_params)
    jax.block_until_ready((mu, sigma, value))

    # correctness check against pure-JAX reference
    mu_r, sigma_r, value_r = reference_forward(x, params)
    assert mu.shape == (B, N_OUTPUT) and sigma.shape == (B, N_OUTPUT) and value.shape == (B, 1)
    assert jnp.allclose(mu, mu_r, atol=2e-5, rtol=1e-4)
    assert jnp.allclose(sigma, sigma_r, atol=2e-5, rtol=1e-4)
    assert jnp.allclose(value, value_r, atol=2e-5, rtol=1e-4)

    print("KERNEL_OK")
</pallas_src>

<mosaic_0001>
module attributes {stable_mosaic.version = 11 : i64} {
  func.func @actor_critic_kernel(%arg0: i32, %arg1: memref<2x256xf32, #tpu.memory_space<vmem>>, %arg2: memref<128x2xf32, #tpu.memory_space<vmem>>, %arg3: memref<128x1xf32, #tpu.memory_space<vmem>>, %arg4: memref<8x128xf32, #tpu.memory_space<vmem>>, %arg5: memref<8x1xf32, #tpu.memory_space<vmem>>, %arg6: memref<8x256xf32, #tpu.memory_space<vmem>>) attributes {dimension_semantics = [#tpu.dimension_semantics<parallel>], iteration_bounds = array<i64: 1>, scalar_prefetch = 0 : i64, scratch_operands = 0 : i64, tpu.core_type = #tpu.core_type<tc>, window_params = [{transform_indices = @transform_0, window_bounds = array<i64: 2, 256>}, {pipeline_mode = #tpu.pipeline_mode<synchronous>, transform_indices = @transform_1, window_bounds = array<i64: 128, 2>}, {pipeline_mode = #tpu.pipeline_mode<synchronous>, transform_indices = @transform_2, window_bounds = array<i64: 128, 1>}, {pipeline_mode = #tpu.pipeline_mode<synchronous>, transform_indices = @transform_3, window_bounds = array<i64: 8, 128>}, {pipeline_mode = #tpu.pipeline_mode<synchronous>, transform_indices = @transform_4, window_bounds = array<i64: 8, 1>}, {transform_indices = @transform_5, window_bounds = array<i64: 8, 256>}]} {
    %c0 = arith.constant 0 : index
    %c0_0 = arith.constant 0 : index
    %0 = vector.load %arg1[%c0, %c0_0] : memref<2x256xf32, #tpu.memory_space<vmem>>, vector<2x256xf32>
    %c0_1 = arith.constant 0 : index
    %c0_2 = arith.constant 0 : index
    %1 = vector.load %arg2[%c0_1, %c0_2] : memref<128x2xf32, #tpu.memory_space<vmem>>, vector<128x2xf32>
    %c0_3 = arith.constant 0 : index
    %c0_4 = arith.constant 0 : index
    %2 = vector.load %arg3[%c0_3, %c0_4] : memref<128x1xf32, #tpu.memory_space<vmem>>, vector<128x1xf32>
    %3 = vector.extract_strided_slice %1 {offsets = [0, 0], sizes = [128, 1], strides = [1, 1]} : vector<128x2xf32> to vector<128x1xf32>
    %4 = vector.extract_strided_slice %0 {offsets = [0, 0], sizes = [1, 256], strides = [1, 1]} : vector<2x256xf32> to vector<1x256xf32>
    %5 = vector.broadcast %3 : vector<128x1xf32> to vector<128x256xf32>
    %6 = vector.broadcast %4 : vector<1x256xf32> to vector<128x256xf32>
    %7 = arith.mulf %5, %6 : vector<128x256xf32>
    %8 = vector.broadcast %2 : vector<128x1xf32> to vector<128x256xf32>
    %9 = arith.addf %8, %7 : vector<128x256xf32>
    %10 = vector.extract_strided_slice %1 {offsets = [0, 1], sizes = [128, 1], strides = [1, 1]} : vector<128x2xf32> to vector<128x1xf32>
    %11 = vector.extract_strided_slice %0 {offsets = [1, 0], sizes = [1, 256], strides = [1, 1]} : vector<2x256xf32> to vector<1x256xf32>
    %12 = vector.broadcast %10 : vector<128x1xf32> to vector<128x256xf32>
    %13 = vector.broadcast %11 : vector<1x256xf32> to vector<128x256xf32>
    %14 = arith.mulf %12, %13 : vector<128x256xf32>
    %15 = arith.addf %9, %14 : vector<128x256xf32>
    %cst = arith.constant 0.000000e+00 : f32
    %16 = vector.broadcast %cst : f32 to vector<128x256xf32>
    %17 = arith.maximumf %15, %16 : vector<128x256xf32>
    %c0_5 = arith.constant 0 : index
    %c0_6 = arith.constant 0 : index
    %18 = vector.load %arg4[%c0_5, %c0_6] : memref<8x128xf32, #tpu.memory_space<vmem>>, vector<8x128xf32>
    %cst_7 = arith.constant dense<0.000000e+00> : vector<8x256xf32>
    %19 = tpu.matmul %18, %17, %cst_7 {dimension_numbers = #tpu.dot_dimension_numbers<[1], [0], [0], [1], [0, 0, 1, 1], [], []>} : vector<8x128xf32>, vector<128x256xf32>, vector<8x256xf32> -> vector<8x256xf32>
    %c0_8 = arith.constant 0 : index
    %c0_9 = arith.constant 0 : index
    %20 = vector.load %arg5[%c0_8, %c0_9] : memref<8x1xf32, #tpu.memory_space<vmem>>, vector<8x1xf32>
    %21 = vector.broadcast %20 : vector<8x1xf32> to vector<8x256xf32>
    %22 = arith.addf %19, %21 : vector<8x256xf32>
    %23 = tpu.iota {dimensions = array<i32: 0>} : vector<8x256xi32>
    %c0_i32 = arith.constant 0 : i32
    %24 = vector.broadcast %c0_i32 : i32 to vector<8x256xi32>
    %25 = arith.cmpi eq, %23, %24 : vector<8x256xi32>
    %26 = math.tanh %22 : vector<8x256xf32>
    %cst_10 = arith.constant 2.000000e+00 : f32
    %27 = vector.broadcast %cst_10 : f32 to vector<8x256xf32>
    %28 = arith.mulf %27, %26 : vector<8x256xf32>
    %c1_i32 = arith.constant 1 : i32
    %29 = vector.broadcast %c1_i32 : i32 to vector<8x256xi32>
    %30 = arith.cmpi eq, %23, %29 : vector<8x256xi32>
    %cst_11 = arith.constant 0.000000e+00 : f32
    %31 = vector.broadcast %cst_11 : f32 to vector<8x256xf32>
    %32 = arith.maximumf %22, %31 : vector<8x256xf32>
    %33 = math.absf %22 : vector<8x256xf32>
    %cst_12 = arith.constant 0.000000e+00 : f32
    %34 = vector.broadcast %cst_12 : f32 to vector<8x256xf32>
    %35 = arith.subf %34, %33 : vector<8x256xf32>
    %36 = math.exp %35 : vector<8x256xf32>
    %37 = math.log1p %36 : vector<8x256xf32>
    %38 = arith.addf %32, %37 : vector<8x256xf32>
    %cst_13 = arith.constant 9.99999974E-6 : f32
    %39 = vector.broadcast %cst_13 : f32 to vector<8x256xf32>
    %40 = arith.addf %38, %39 : vector<8x256xf32>
    %41 = arith.select %30, %40, %22 : vector<8x256xi1>, vector<8x256xf32>
    %42 = arith.select %25, %28, %41 : vector<8x256xi1>, vector<8x256xf32>
    %c0_14 = arith.constant 0 : index
    %c0_15 = arith.constant 0 : index
    %43 = vector.load %arg6[%c0_14, %c0_15] : memref<8x256xf32, #tpu.memory_space<vmem>>, vector<8x256xf32>
    tpu.vector_store %arg6[%c0_14, %c0_15], %42 {strides = array<i32>} : memref<8x256xf32, #tpu.memory_space<vmem>>, vector<8x256xf32>,
    return
  }
  func.func @transform_0(%arg0: i32) -> (i32, i32) {
    %c0_i32 = arith.constant 0 : i32
    %c0_i32_0 = arith.constant 0 : i32
    return %c0_i32, %arg0 : i32, i32
  }
  func.func @transform_1(%arg0: i32) -> (i32, i32) {
    %c0_i32 = arith.constant 0 : i32
    %c0_i32_0 = arith.constant 0 : i32
    %c0_i32_1 = arith.constant 0 : i32
    return %c0_i32, %c0_i32_0 : i32, i32
  }
  func.func @transform_2(%arg0: i32) -> (i32, i32) {
    %c0_i32 = arith.constant 0 : i32
    %c0_i32_0 = arith.constant 0 : i32
    %c0_i32_1 = arith.constant 0 : i32
    return %c0_i32, %c0_i32_0 : i32, i32
  }
  func.func @transform_3(%arg0: i32) -> (i32, i32) {
    %c0_i32 = arith.constant 0 : i32
    %c0_i32_0 = arith.constant 0 : i32
    %c0_i32_1 = arith.constant 0 : i32
    return %c0_i32, %c0_i32_0 : i32, i32
  }
  func.func @transform_4(%arg0: i32) -> (i32, i32) {
    %c0_i32 = arith.constant 0 : i32
    %c0_i32_0 = arith.constant 0 : i32
    %c0_i32_1 = arith.constant 0 : i32
    return %c0_i32, %c0_i32_0 : i32, i32
  }
  func.func @transform_5(%arg0: i32) -> (i32, i32) {
    %c0_i32 = arith.constant 0 : i32
    %c0_i32_0 = arith.constant 0 : i32
    return %c0_i32, %arg0 : i32, i32
  }
}

</mosaic_0001>

<bundles_post_ra>
// kernel: actor_critic_forward.1
= control target key start
LH: loop header
LB: loop body
LE: loop exit
PB: predicated region body
PF: predicated region fallthrough
CT: control target
= control target key end

     0   :  { %v577_v0 = vmov 1   ;;  %v578_v1 = vmov 0   ;;  %s910_s1 = inlined_call_operand.vmem [shape: f32[128,2], index: 1, kind: input, shape index: {}]   ;;  %s911_s2 = inlined_call_operand.vmem [shape: f32[128,1], index: 2, kind: input, shape index: {}]   ;;  %s912_s0 = inlined_call_operand.vmem [shape: f32[2,256], index: 0, kind: input, shape index: {}]   ;;  %s913_s4 = inlined_call_operand.vmem [shape: f32[8,1], index: 4, kind: input, shape index: {}]   ;;  %s914_s3 = inlined_call_operand.vmem [shape: f32[8,128], index: 3, kind: input, shape index: {}]   ;;  %s915_s5 = inlined_call_operand.vmem [shape: f32[8,256], index: 5, kind: output, shape index: {}]  }
   0x1   :  { %552 = vset.pattern.permute.xlu0 %v577_v0  ;;  %550 = vset.pattern.permute.xlu2 %v578_v1  ;;  %v31_v2 = vld [vmem:[%s910_s1 + $0x50] sm:$0xff]  ;;  %v617_v3 = vld [vmem:[%s910_s1 + $0x20] sm:$0xff]  ;;  %v26_v5 = vld [vmem:[%s910_s1 + $0x28] sm:$0xff] }
   0x2   :  { %v622_v4 = vld [vmem:[%s910_s1 + $0x10] sm:$0xff]  ;;  %549 = vset.pattern.permute.xlu1 %v578_v1  ;;  %325 = vperm.xlu0 %552, %v31_v2   ;;  %v633_v6 = vld [vmem:[%s910_s1 + $0x18] sm:$0xff]  ;;  %v29_v7 = vld [vmem:[%s910_s1 + $0x40] sm:$0xff] }
   0x3   :  { %75 = vperm.xlu2 %550, %v617_v3   ;;  %65 = vperm.xlu1 %549, %v622_v4   ;;  %v28_v8 = vld [vmem:[%s910_s1 + $0x38] sm:$0xff]  ;;  %v645_v9 = vld [vmem:[%s910_s1] sm:$0xff]  ;;  %v35_v10 = vld [vmem:[%s910_s1 + $0x70] sm:$0xff] }
   0x4   :  { %v36_v11 = vld [vmem:[%s910_s1 + $0x78] sm:$0xff]  ;;  %v658_v12 = vld [vmem:[%s910_s1 + $0x8] sm:$0xff]  ;;  %v27_v14 = vld [vmem:[%s910_s1 + $0x30] sm:$0xff] }
   0x5   :  { %v34_v13 = vld [vmem:[%s910_s1 + $0x68] sm:$0xff]  ;;  %v33_v15 = vld [vmem:[%s910_s1 + $0x60] sm:$0xff]  ;;  %v32_v17 = vld [vmem:[%s910_s1 + $0x58] sm:$0xff] }
   0x6   :  { %v30_v16 = vld [vmem:[%s910_s1 + $0x48] sm:$0xff]  ;;  %v52_v18 = vld [vmem:[%s911_s2 + $0x78] sm:$0xff]  ;;  %v51_v19 = vld [vmem:[%s911_s2 + $0x70] sm:$0xff] }
   0x7   :  { %v47_v20 = vld [vmem:[%s911_s2 + $0x50] sm:$0xff]  ;;  %v50_v21 = vld [vmem:[%s911_s2 + $0x68] sm:$0xff]  ;;  %v49_v22 = vld [vmem:[%s911_s2 + $0x60] sm:$0xff] }
   0x8   :  { %v46_v23 = vld [vmem:[%s911_s2 + $0x48] sm:$0xff]  ;;  %v48_v24 = vld [vmem:[%s911_s2 + $0x58] sm:$0xff]  ;;  %v45_v25 = vld [vmem:[%s911_s2 + $0x40] sm:$0xff] }
   0x9   :  { %v44_v26 = vld [vmem:[%s911_s2 + $0x38] sm:$0xff]  ;;  %v43_v27 = vld [vmem:[%s911_s2 + $0x30] sm:$0xff]  ;;  %v42_v30 = vld [vmem:[%s911_s2 + $0x28] sm:$0xff] }
   0xa   :  { %305 = vperm.xlu0 %552, %v26_v5   ;;  %v39_v29 = vld [vmem:[%s911_s2 + $0x10] sm:$0xff]  ;;  %v41_v33 = vld [vmem:[%s911_s2 + $0x20] sm:$0xff]  ;;  %v40_v37 = vld [vmem:[%s911_s2 + $0x18] sm:$0xff] }
   0xb   :  { %80 = vperm.xlu2 %550, %v26_v5   ;;  %70 = vperm.xlu1 %549, %v633_v6   ;;  %v38_v39 = vld [vmem:[%s911_s2 + $0x8] sm:$0xff]  ;;  %v37_v42 = vld [vmem:[%s911_s2] sm:$0xff] }
   0xc   :  { %v20_v52 = vld [vmem:[%s912_s0] sm:$0xf] }
   0xd   :  { %v134_v55 = vperm.slane %v20_v52, 0  ;;  %v135_v56 = vperm.slane %v20_v52, 2  ;;  %v348_v58 = vperm.slane %v20_v52, 1  ;;  %v349_v59 = vperm.slane %v20_v52, 3 }
   0xf   :  { %v776_v60 = vperm.slane %v134_v55, 0  ;;  %v778_v61 = vperm.slane %v135_v56, 0  ;;  %v780_v62 = vperm.slane %v348_v58, 1  ;;  %v782_v63 = vperm.slane %v349_v59, 1 }
  0x12   :  { %557 = vset.pattern.permute.xlu0 %v578_v1 }
  0x13   :  { %95 = vperm.xlu2 %550, %v29_v7   ;;  %90 = vperm.xlu1 %549, %v28_v8  }
  0x14   :  { %55 = vperm.xlu0 %557, %v645_v9  }
  0x1b   :  { %125 = vperm.xlu2 %550, %v35_v10   ;;  %130 = vperm.xlu1 %549, %v36_v11  }
  0x1c   :  { %60 = vperm.xlu0 %557, %v658_v12  }
  0x23   :  { %120 = vperm.xlu2 %550, %v34_v13   ;;  %551 = vset.pattern.permute.xlu1 %v577_v0 }
  0x24   :  { %345 = vperm.xlu1 %551, %v36_v11   ;;  %85 = vperm.xlu0 %557, %v27_v14  }
  0x2b   :  { %115 = vperm.xlu2 %550, %v33_v15  }
  0x2c   :  { %341 = vperm.xlu1 %551, %v35_v10   ;;  %100 = vperm.xlu0 %557, %v30_v16  }
  0x33   :  { %110 = vperm.xlu2 %550, %v32_v17  }
  0x34   :  { %337 = vperm.xlu1 %551, %v34_v13   ;;  %249 = vperm.xlu0 %557, %v52_v18  }
  0x3b   :  { %105 = vperm.xlu2 %550, %v31_v2  }
  0x3c   :  { %333 = vperm.xlu1 %551, %v33_v15   ;;  %244 = vperm.xlu0 %557, %v51_v19  }
  0x43   :  { %224 = vperm.xlu2 %550, %v47_v20  }
  0x44   :  { %329 = vperm.xlu1 %551, %v32_v17   ;;  %239 = vperm.xlu0 %557, %v50_v21  }
  0x4b   :  { %554 = vset.pattern.permute.xlu2 %v577_v0 }
  0x4c   :  { %321 = vperm.xlu2 %554, %v30_v16   ;;  %553 = vset.pattern.permute.xlu1 %v578_v1 }
  0x4d   :  { %234 = vperm.xlu0 %557, %v49_v22   ;;  %219 = vperm.xlu1 %553, %v46_v23  }
  0x54   :  { %317 = vperm.xlu2 %554, %v29_v7  }
  0x55   :  { %229 = vperm.xlu0 %557, %v48_v24   ;;  %214 = vperm.xlu1 %553, %v45_v25  }
  0x5c   :  { %556 = vset.pattern.permute.xlu2 %v578_v1 }
  0x5d   :  { %209 = vperm.xlu0 %557, %v44_v26   ;;  %204 = vperm.xlu2 %556, %v43_v27   ;;  %v710_v28 = vpop.permute.xlu2 %75 }
  0x5e   :  { %555 = vset.pattern.permute.xlu1 %v577_v0 }
  0x5f   :  { %313 = vperm.xlu1 %555, %v28_v8  }
  0x65   :  { %184 = vperm.xlu0 %557, %v39_v29   ;;  %199 = vperm.xlu2 %556, %v42_v30   ;;  %v719_v31 = vpop.permute.xlu2 %80 }
  0x66   :  { %v151_v55 = vmul.f32 %v778_v61, %v719_v31 }
  0x67   :  { %309 = vperm.xlu1 %555, %v27_v14  }
  0x6d   :  { %559 = vset.pattern.permute.xlu2 %v577_v0  ;;  %v722_v32 = vpop.permute.xlu2 %95  ;;  %562 = vset.pattern.permute.xlu0 %v577_v0 }
  0x6e   :  { %301 = vperm.xlu2 %559, %v617_v3   ;;  %285 = vperm.xlu0 %562, %v645_v9  }
  0x6f   :  { %558 = vset.pattern.permute.xlu1 %v578_v1 }
  0x70   :  { %194 = vperm.xlu1 %558, %v41_v33  }
  0x74   :  { %v731_v34 = vpop.permute.xlu0 %325 }
  0x75   :  { %v126_v35 = vpop.permute.xlu2 %125  ;;  %v733_v36 = vpop.permute.xlu1 %65 }
  0x76   :  { %297 = vperm.xlu2 %559, %v633_v6   ;;  %564 = vset.pattern.permute.xlu0 %v578_v1  ;;  %v168_v13 = vmul.f32 %v776_v60, %v126_v35  ;;  %v169_v14 = vmul.f32 %v778_v61, %v126_v35 }
  0x78   :  { %189 = vperm.xlu1 %558, %v40_v37  }
  0x7c   :  { %v740_v38 = vpop.permute.xlu0 %305 }
  0x7d   :  { %v121_v40 = vpop.permute.xlu2 %120  ;;  %v745_v41 = vpop.permute.xlu1 %70  ;;  %v364_v59 = vmul.f32 %v780_v62, %v740_v38 }
  0x7e   :  { %561 = vset.pattern.permute.xlu2 %v578_v1  ;;  %v166_v26 = vmul.f32 %v776_v60, %v121_v40  ;;  %v167_v27 = vmul.f32 %v778_v61, %v121_v40  ;;  %v150_v40 = vmul.f32 %v776_v60, %v719_v31 }
  0x7f   :  { %179 = vperm.xlu2 %561, %v38_v39  }
  0x80   :  { %560 = vset.pattern.permute.xlu1 %v577_v0 }
  0x81   :  { %293 = vperm.xlu1 %560, %v622_v4  }
  0x85   :  { %v753_v43 = vpop.permute.xlu2 %115  ;;  %v755_v44 = vpop.permute.xlu1 %90 }
  0x86   :  { %v757_v45 = vpop.permute.xlu0 %55  ;;  %v164_v56 = vmul.f32 %v776_v60, %v753_v43  ;;  %v165_v58 = vmul.f32 %v778_v61, %v753_v43 }
  0x87   :  { %174 = vperm.xlu2 %561, %v37_v42  }
  0x89   :  { %289 = vperm.xlu1 %560, %v658_v12  }
  0x8d   :  { %v760_v46 = vpop.permute.xlu2 %110  ;;  %v131_v47 = vpop.permute.xlu1 %130 }
  0x8e   :  { %v762_v48 = vpop.permute.xlu0 %60  ;;  %v170_v0 = vmul.f32 %v776_v60, %v131_v47 }
  0x91   :  { %563 = vset.pattern.permute.xlu1 %v578_v1  ;;  %v171_v1 = vmul.f32 %v778_v61, %v131_v47 }
  0x95   :  { %v765_v49 = vpop.permute.xlu2 %105 }
  0x96   :  { %v346_v50 = vpop.permute.xlu1 %345  ;;  %v767_v51 = vpop.permute.xlu0 %85 }
  0x97   :  { %v384_v4 = vmul.f32 %v780_v62, %v346_v50  ;;  %v385_v5 = vmul.f32 %v782_v63, %v346_v50 }
  0x9d   :  { %v774_v57 = vpop.permute.xlu2 %224 }
  0x9e   :  { %v342_v53 = vpop.permute.xlu1 %341  ;;  %v772_v54 = vpop.permute.xlu0 %100 }
  0x9f   :  { %v382_v17 = vmul.f32 %v780_v62, %v342_v53  ;;  %v383_v18 = vmul.f32 %v782_v63, %v342_v53 }
  0xa6   :  { %v338_v2 = vpop.permute.xlu1 %337  ;;  %v250_v3 = vpop.permute.xlu0 %249 }
  0xa7   :  { %v282_v6 = vadd.f32 %v250_v3, %v170_v0  ;;  %v283_v7 = vadd.f32 %v250_v3, %v171_v1  ;;  %v788_v8 = vpop.permute.xlu2 %321  ;;  %v380_v33 = vmul.f32 %v780_v62, %v338_v2  ;;  %v381_v35 = vmul.f32 %v782_v63, %v338_v2 }
  0xa8   :  { %v365_v0 = vmul.f32 %v782_v63, %v740_v38  ;;  %v156_v38 = vmul.f32 %v776_v60, %v722_v32 }
  0xa9   :  { %v416_v9 = vadd.f32 %v384_v4, %v282_v6  ;;  %v417_v10 = vadd.f32 %v385_v5, %v283_v7 }
  0xab   :  { %v448_v11 = vmax.f32 %v416_v9, 0.0  ;;  %v449_v12 = vmax.f32 %v417_v10, 0.0 }
  0xad   :  { %457 = vmatpush.msra.mxu0 %v448_v11  ;;  %477 = vmatpush.msra.mxu1 %v449_v12 }
  0xae   :  { %v334_v15 = vpop.permute.xlu1 %333  ;;  %v245_v16 = vpop.permute.xlu0 %244 }
  0xaf   :  { %v280_v19 = vadd.f32 %v245_v16, %v168_v13  ;;  %v281_v20 = vadd.f32 %v245_v16, %v169_v14  ;;  %v794_v21 = vpop.permute.xlu2 %317  ;;  %v378_v1 = vmul.f32 %v780_v62, %v334_v15  ;;  %v379_v2 = vmul.f32 %v782_v63, %v334_v15 }
  0xb0   :  { %v157_v13 = vmul.f32 %v778_v61, %v722_v32  ;;  %v160_v14 = vmul.f32 %v776_v60, %v765_v49  ;;  %v374_v15 = vmul.f32 %v780_v62, %v731_v34  ;;  %v161_v16 = vmul.f32 %v778_v61, %v765_v49 }
  0xb1   :  { %v414_v22 = vadd.f32 %v382_v17, %v280_v19  ;;  %v415_v23 = vadd.f32 %v383_v18, %v281_v20  ;;  %v375_v19 = vmul.f32 %v782_v63, %v731_v34  ;;  %v162_v20 = vmul.f32 %v776_v60, %v760_v46 }
  0xb2   :  { %v163_v32 = vmul.f32 %v778_v61, %v760_v46  ;;  %v159_v49 = vmul.f32 %v778_v61, %v772_v54  ;;  %v372_v34 = vmul.f32 %v780_v62, %v788_v8 }
  0xb3   :  { %v446_v24 = vmax.f32 %v414_v22, 0.0  ;;  %v447_v25 = vmax.f32 %v415_v23, 0.0  ;;  %v272_v22 = vadd.f32 %v774_v57, %v160_v14  ;;  %v273_v23 = vadd.f32 %v774_v57, %v161_v16 }
  0xb5   :  { %458 = vmatpush.msra.mxu0 %v446_v24  ;;  %478 = vmatpush.msra.mxu1 %v447_v25  ;;  %v158_v24 = vmul.f32 %v776_v60, %v772_v54  ;;  %v373_v25 = vmul.f32 %v782_v63, %v788_v8  ;;  %v406_v54 = vadd.f32 %v374_v15, %v272_v22 }
  0xb6   :  { %v330_v29 = vpop.permute.xlu1 %329  ;;  %v240_v30 = vpop.permute.xlu0 %239  ;;  %v371_v8 = vmul.f32 %v782_v63, %v794_v21 }
  0xb7   :  { %v278_v37 = vadd.f32 %v240_v30, %v166_v26  ;;  %v279_v39 = vadd.f32 %v240_v30, %v167_v27  ;;  %v800_v42 = vpop.permute.xlu2 %204  ;;  %v376_v46 = vmul.f32 %v780_v62, %v330_v29  ;;  %v377_v26 = vmul.f32 %v782_v63, %v330_v29 }
  0xb9   :  { %v412_v47 = vadd.f32 %v380_v33, %v278_v37  ;;  %v413_v50 = vadd.f32 %v381_v35, %v279_v39 }
  0xbb   :  { %v444_v52 = vmax.f32 %v412_v47, 0.0  ;;  %v445_v53 = vmax.f32 %v413_v50, 0.0 }
  0xbd   :  { %459 = vmatpush.msra.mxu0 %v444_v52  ;;  %479 = vmatpush.msra.mxu1 %v445_v53  ;;  %v407_v53 = vadd.f32 %v375_v19, %v273_v23 }
  0xbf   :  { %v235_v3 = vpop.permute.xlu0 %234  ;;  %v200_v4 = vpop.permute.xlu2 %199 }
  0xc0   :  { %v276_v5 = vadd.f32 %v235_v3, %v164_v56  ;;  %v277_v31 = vadd.f32 %v235_v3, %v165_v58  ;;  %v262_v6 = vadd.f32 %v200_v4, %v150_v40  ;;  %v263_v7 = vadd.f32 %v200_v4, %v151_v55  ;;  %v220_v9 = vpop.permute.xlu1 %219 }
  0xc1   :  { %v270_v57 = vadd.f32 %v220_v9, %v158_v24  ;;  %v271_v30 = vadd.f32 %v220_v9, %v159_v49  ;;  %v370_v40 = vmul.f32 %v780_v62, %v794_v21  ;;  %v154_v3 = vmul.f32 %v776_v60, %v755_v44 }
  0xc2   :  { %v410_v10 = vadd.f32 %v378_v1, %v276_v5  ;;  %v411_v11 = vadd.f32 %v379_v2, %v277_v31  ;;  %v816_v43 = vadd.f32 %v364_v59, %v262_v6  ;;  %v818_v12 = vadd.f32 %v365_v0, %v263_v7 }
  0xc3   :  { %v404_v56 = vadd.f32 %v372_v34, %v270_v57  ;;  %v405_v58 = vadd.f32 %v373_v25, %v271_v30  ;;  %v438_v0 = vmax.f32 %v406_v54, 0.0  ;;  %v439_v1 = vmax.f32 %v407_v53, 0.0 }
  0xc4   :  { %v442_v17 = vmax.f32 %v410_v10, 0.0  ;;  %v443_v18 = vmax.f32 %v411_v11, 0.0  ;;  %v155_v5 = vmul.f32 %v778_v61, %v755_v44 }
  0xc5   :  { %v436_v21 = vmax.f32 %v404_v56, 0.0  ;;  %v437_v31 = vmax.f32 %v405_v58, 0.0 }
  0xc6   :  { %460 = vmatpush.msra.mxu0 %v442_v17  ;;  %480 = vmatpush.msra.mxu1 %v443_v18  ;;  %v152_v17 = vmul.f32 %v776_v60, %v767_v51  ;;  %v153_v18 = vmul.f32 %v778_v61, %v767_v51  ;;  %v428_v51 = vmax.f32 %v816_v43, 0.0 }
  0xc7   :  { %v230_v27 = vpop.permute.xlu0 %229 }
  0xc8   :  { %v274_v33 = vadd.f32 %v230_v27, %v162_v20  ;;  %v275_v35 = vadd.f32 %v230_v27, %v163_v32  ;;  %v215_v37 = vpop.permute.xlu1 %214  ;;  %v302_v19 = vpop.permute.xlu2 %301  ;;  %v264_v32 = vadd.f32 %v800_v42, %v152_v17  ;;  %v265_v22 = vadd.f32 %v800_v42, %v153_v18 }
  0xc9   :  { %v268_v39 = vadd.f32 %v215_v37, %v156_v38  ;;  %v269_v47 = vadd.f32 %v215_v37, %v157_v13  ;;  %v148_v27 = vmul.f32 %v776_v60, %v710_v28  ;;  %v149_v42 = vmul.f32 %v778_v61, %v710_v28 }
  0xca   :  { %v408_v50 = vadd.f32 %v376_v46, %v274_v33  ;;  %v409_v52 = vadd.f32 %v377_v26, %v275_v35  ;;  %v429_v26 = vmax.f32 %v818_v12, 0.0  ;;  %v362_v57 = vmul.f32 %v780_v62, %v302_v19  ;;  %v451_v12 = vld [vmem:[%s913_s4] sm:$0xff] }
  0xcb   :  { %v402_v59 = vadd.f32 %v370_v40, %v268_v39  ;;  %v403_v2 = vadd.f32 %v371_v8, %v269_v47  ;;  %v363_v30 = vmul.f32 %v782_v63, %v302_v19  ;;  %454 = vperm.xlu1 %563, %v451_v12   ;;  %v146_v28 = vmul.f32 %v776_v60, %v745_v41 }
  0xcc   :  { %v440_v55 = vmax.f32 %v408_v50, 0.0  ;;  %v441_v29 = vmax.f32 %v409_v52, 0.0  ;;  %v147_v52 = vmul.f32 %v778_v61, %v745_v41  ;;  %v144_v41 = vmul.f32 %v776_v60, %v733_v36 }
  0xcd   :  { %v434_v9 = vmax.f32 %v402_v59, 0.0  ;;  %v435_v13 = vmax.f32 %v403_v2, 0.0 }
  0xce   :  { %461 = vmatpush.msra.mxu0 %v440_v55  ;;  %481 = vmatpush.msra.mxu1 %v441_v29 }
  0xcf   :  { %v210_v4 = vpop.permute.xlu0 %209 }
  0xd0   :  { %462 = vmatpush.msra.mxu0 %v438_v0  ;;  %482 = vmatpush.msra.mxu1 %v439_v1  ;;  %v266_v6 = vadd.f32 %v210_v4, %v154_v3  ;;  %v267_v10 = vadd.f32 %v210_v4, %v155_v5  ;;  %v298_v35 = vpop.permute.xlu2 %297  ;;  %v145_v3 = vmul.f32 %v778_v61, %v733_v36 }
  0xd1   :  { %v314_v7 = vpop.permute.xlu1 %313  ;;  %v360_v40 = vmul.f32 %v780_v62, %v298_v35  ;;  %v361_v8 = vmul.f32 %v782_v63, %v298_v35  ;;  %v142_v36 = vmul.f32 %v776_v60, %v762_v48 }
  0xd2   :  { %v368_v11 = vmul.f32 %v780_v62, %v314_v7  ;;  %v369_v38 = vmul.f32 %v782_v63, %v314_v7  ;;  %463 = vmatpush.msra.mxu0 %v436_v21  ;;  %483 = vmatpush.msra.mxu1 %v437_v31 }
  0xd4   :  { %464 = vmatpush.msra.mxu0 %v434_v9  ;;  %484 = vmatpush.msra.mxu1 %v435_v13  ;;  %v400_v14 = vadd.f32 %v368_v11, %v266_v6  ;;  %v401_v15 = vadd.f32 %v369_v38, %v267_v10  ;;  %v140_v38 = vmul.f32 %v776_v60, %v757_v45 }
  0xd5   :  { %v141_v13 = vmul.f32 %v778_v61, %v757_v45 }
  0xd6   :  { %v432_v44 = vmax.f32 %v400_v14, 0.0  ;;  %v433_v16 = vmax.f32 %v401_v15, 0.0 }
  0xd7   :  { %v185_v0 = vpop.permute.xlu0 %184 }
  0xd8   :  { %465 = vmatpush.msra.mxu0 %v432_v44  ;;  %485 = vmatpush.msra.mxu1 %v433_v16  ;;  %v256_v5 = vadd.f32 %v185_v0, %v144_v41  ;;  %v257_v21 = vadd.f32 %v185_v0, %v145_v3  ;;  %v143_v44 = vmul.f32 %v778_v61, %v762_v48 }
  0xd9   :  { %v310_v20 = vpop.permute.xlu1 %309  ;;  %v180_v56 = vpop.permute.xlu2 %179 }
  0xda   :  { %v366_v23 = vmul.f32 %v780_v62, %v310_v20  ;;  %v367_v24 = vmul.f32 %v782_v63, %v310_v20 }
  0xdc   :  { %v398_v49 = vadd.f32 %v366_v23, %v264_v32  ;;  %v399_v34 = vadd.f32 %v367_v24, %v265_v22  ;;  %v254_v32 = vadd.f32 %v180_v56, %v142_v36  ;;  %v255_v22 = vadd.f32 %v180_v56, %v143_v44 }
  0xde   :  { %v430_v25 = vmax.f32 %v398_v49, 0.0  ;;  %v431_v46 = vmax.f32 %v399_v34, 0.0 }
  0xe0   :  { %466 = vmatpush.msra.mxu0 %v430_v25  ;;  %486 = vmatpush.msra.mxu1 %v431_v46  ;;  %v286_v7 = vpop.permute.xlu0 %285 }
  0xe1   :  { %v175_v11 = vpop.permute.xlu2 %174  ;;  %v354_v16 = vmul.f32 %v780_v62, %v286_v7  ;;  %v355_v19 = vmul.f32 %v782_v63, %v286_v7 }
  0xe2   :  { %v195_v33 = vpop.permute.xlu1 %194  ;;  %467 = vmatpush.msra.mxu0 %v428_v51  ;;  %487 = vmatpush.msra.mxu1 %v429_v26  ;;  %v252_v17 = vadd.f32 %v175_v11, %v140_v38  ;;  %v253_v18 = vadd.f32 %v175_v11, %v141_v13  ;;  %v450_v51 = vld [vmem:[%s914_s3] sm:$0xff] }
  0xe3   :  { %v260_v37 = vadd.f32 %v195_v33, %v148_v27  ;;  %v261_v39 = vadd.f32 %v195_v33, %v149_v42 }
  0xe4   :  { %v386_v49 = vadd.f32 %v354_v16, %v252_v17  ;;  %v387_v34 = vadd.f32 %v355_v19, %v253_v18 }
  0xe5   :  { %v394_v54 = vadd.f32 %v362_v57, %v260_v37  ;;  %v395_v43 = vadd.f32 %v363_v30, %v261_v39 }
  0xe6   :  { %v418_v25 = vmax.f32 %v386_v49, 0.0  ;;  %v419_v46 = vmax.f32 %v387_v34, 0.0 }
  0xe7   :  { %v426_v47 = vmax.f32 %v394_v54, 0.0  ;;  %v427_v50 = vmax.f32 %v395_v43, 0.0 }
  0xe9   :  { %468 = vmatpush.msra.mxu0 %v426_v47  ;;  %488 = vmatpush.msra.mxu1 %v427_v50 }
  0xea   :  { %v190_v53 = vpop.permute.xlu1 %189 }
  0xeb   :  { %v258_v55 = vadd.f32 %v190_v53, %v146_v28  ;;  %v259_v29 = vadd.f32 %v190_v53, %v147_v52  ;;  %v497_v52 = vlaneseq }
  0xed   :  { %v392_v58 = vadd.f32 %v360_v40, %v258_v55  ;;  %v393_v59 = vadd.f32 %v361_v8, %v259_v29 }
  0xef   :  { %v424_v1 = vmax.f32 %v392_v58, 0.0  ;;  %v425_v2 = vmax.f32 %v393_v59, 0.0  ;;  %v498_v58 = vshrl.u32 %v497_v52, 7 }
  0xf1   :  { %469 = vmatpush.msra.mxu0 %v424_v1  ;;  %489 = vmatpush.msra.mxu1 %v425_v2  ;;  %vm504_vm2 = vcmp.eq.s32.totalorder %v498_v58, 1  ;;  %vm499_vm3 = vcmp.eq.s32.totalorder %v498_v58, 0 }
  0xf3   :  { %v294_v4 = vpop.permute.xlu1 %293 }
  0xf4   :  { %v358_v31 = vmul.f32 %v780_v62, %v294_v4  ;;  %v359_v6 = vmul.f32 %v782_v63, %v294_v4 }
  0xf6   :  { %v390_v9 = vadd.f32 %v358_v31, %v256_v5  ;;  %v391_v10 = vadd.f32 %v359_v6, %v257_v21 }
  0xf8   :  { %v422_v14 = vmax.f32 %v390_v9, 0.0  ;;  %v423_v15 = vmax.f32 %v391_v10, 0.0 }
  0xfa   :  { %470 = vmatpush.msra.mxu0 %v422_v14  ;;  %490 = vmatpush.msra.mxu1 %v423_v15 }
  0xfb   :  { %v290_v20 = vpop.permute.xlu1 %289 }
  0xfc   :  { %v356_v45 = vmul.f32 %v780_v62, %v290_v20  ;;  %v357_v23 = vmul.f32 %v782_v63, %v290_v20 }
  0xfe   :  { %v388_v24 = vadd.f32 %v356_v45, %v254_v32  ;;  %v389_v60 = vadd.f32 %v357_v23, %v255_v22 }
 0x100   :  { %v420_v48 = vmax.f32 %v388_v24, 0.0  ;;  %v421_v61 = vmax.f32 %v389_v60, 0.0 }
 0x102   :  { %471 = vmatpush.msra.mxu0 %v420_v48  ;;  %491 = vmatpush.msra.mxu1 %v421_v61 }
 0x104   :  { %472 = vmatpush.msra.mxu0 %v418_v25  ;;  %492 = vmatpush.msra.mxu1 %v419_v46 }
 0x105   :  { %473 = vmatmul.f32.vlgmr.msra.gmra.mxu0 %v450_v51  ;;  %493 = vmatmul.f32.vlgmr.msra.gmra.mxu1 %v450_v51 }
 0x13d   :  { %v455_v62 = vpop.permute.xlu1 %454 }
 0x182   :  { %v474_v63 = vpop.f32.mrf.mxu0  ;;  %v494_v26 = vpop.f32.mrf.mxu1 }
 0x183   :  { %v475_v27 = vadd.f32 %v474_v63, %v455_v62  ;;  %v495_v42 = vadd.f32 %v494_v26, %v455_v62 }
 0x185   :  { %v507_v57 = vand.u32 2147483647, %v475_v27  ;;  %v508_v30 = vand.u32 2147483647, %v495_v42  ;;  %v505_v1 = vmax.f32 %v475_v27, 0.0  ;;  %v506_v4 = vmax.f32 %v495_v42, 0.0 }
 0x187   :  { %v509_v33 = vsub.f32 0.0, %v507_v57  ;;  %v510_v35 = vsub.f32 0.0, %v508_v30 }
 0x189   :  { %v511_v37 = vmul.f32 1.442695, %v509_v33  ;;  %v513_v39 = vmul.f32 1.442695, %v510_v35 }
 0x18b   :  { %565 = vpow2.f32 %v511_v37 }
 0x18c   :  { %567 = vpow2.f32 %v513_v39 }
 0x191   :  { %v566_v54 = vpop.eup %565 }
 0x192   :  { %v568_v43 = vpop.eup %567  ;;  %v515_v12 = vadd.f32 1.0, %v566_v54  ;;  %v518_v47 = vmul.f32 -0.5, %v566_v54  ;;  %v521_v40 = vand.u32 2147483647, %v566_v54 }
 0x193   :  { %v524_v50 = vadd.f32 1.0, %v568_v43  ;;  %v527_v28 = vmul.f32 -0.5, %v568_v43  ;;  %v530_v55 = vand.u32 2147483647, %v568_v43 }
 0x194   :  { %569 = vlog2.f32 %v515_v12  ;;  %v519_v53 = vadd.f32 1.0, %v518_v47  ;;  %vm522_vm0 = vcmp.lt.f32.partialorder %v521_v40, 0.0004427343 }
 0x195   :  { %571 = vlog2.f32 %v524_v50  ;;  %v528_v8 = vadd.f32 1.0, %v527_v28  ;;  %vm531_vm1 = vcmp.lt.f32.partialorder %v530_v55, 0.0004427343 }
 0x196   :  { %573 = vtanh.f32 %v475_v27  ;;  %v520_v0 = vmul.f32 %v566_v54, %v519_v53 }
 0x197   :  { %575 = vtanh.f32 %v495_v42  ;;  %v529_v41 = vmul.f32 %v568_v43, %v528_v8 }
 0x19a   :  { %v570_v29 = vpop.eup %569 }
 0x19b   :  { %v572_v56 = vpop.eup %571  ;;  %v517_v59 = vmul.f32 0.6931472, %v570_v29 }
 0x19c   :  { %v526_v2 = vmul.f32 0.6931472, %v572_v56  ;;  %v574_v5 = vpop.eup %573 }
 0x19d   :  { %v523_v3 = vsel %vm522_vm0, %v520_v0, %v517_v59  ;;  %v576_v6 = vpop.eup %575  ;;  %v502_v10 = vmul.f32 2.0, %v574_v5 }
 0x19e   :  { %v533_v21 = vadd.f32 %v523_v3, %v505_v1  ;;  %v532_v31 = vsel %vm531_vm1, %v529_v41, %v526_v2  ;;  %v503_v13 = vmul.f32 2.0, %v576_v6 }
 0x19f   :  { %v534_v7 = vadd.f32 %v532_v31, %v506_v4 }
 0x1a0   :  { %v535_v9 = vadd.f32 1e-05, %v533_v21 }
 0x1a1   :  { %v536_v11 = vadd.f32 1e-05, %v534_v7 }
 0x1a2   :  { %v537_v38 = vsel %vm504_vm2, %v535_v9, %v475_v27 }
 0x1a3   :  { %v539_v14 = vsel %vm499_vm3, %v502_v10, %v537_v38  ;;  %v538_v15 = vsel %vm504_vm2, %v536_v11, %v495_v42 }
 0x1a4   :  { %541 = vst [vmem:[%s915_s5] sm:$0xff] %v539_v14  ;;  %v540_v36 = vsel %vm499_vm3, %v503_v13, %v538_v15 }
 0x1a5   :  { %542 = vst [vmem:[%s915_s5 + $0x8] sm:$0xff] %v540_v36 }

</bundles_post_ra>
